<compile_context>
chip_gen: v7x
topology: tpu7x:2x2x1
jax: 0.10.0
libtpu: 0.0.40
codegen_flags: <defaults>
</compile_context>

<pallas_src>
import jax
import jax.numpy as jnp
from jax.experimental import pallas as pl
from jax.experimental.pallas import tpu as pltpu

_MIB = 1024 * 1024


# --------------------------------------------------------------------------
# Kernel bodies
# --------------------------------------------------------------------------
def _copy_kernel(x_ref, o_ref):
    # Pure copy of the current lane-dense tile (DMA-bound; no body tuning
    # needed — the binding resource is HBM bandwidth, not any VLIW slot).
    o_ref[...] = x_ref[...]


def _noop_kernel(x_ref, o_ref):
    # Zero-traffic kernel boundary: both refs live in HBM and the output is
    # aliased to the input, so there is nothing to move.  `touch` pins a fake
    # read/write dependency so the aliased output materializes here.
    pltpu.touch(o_ref)


# --------------------------------------------------------------------------
# Lane-dense layout selection (for kernel_mode="copy")
# --------------------------------------------------------------------------
def _sublane_multiple(dtype):
    """Sublane alignment: 8 rows for 32-bit, 16 for 16-bit, 32 for 8-bit."""
    itemsize = jnp.dtype(dtype).itemsize
    return max(8, 32 // max(1, itemsize))


def _lane_dense_layout(n_elems, dtype, *, max_cols=2048,
                       target_tile_bytes=4 * _MIB):
    """Pick a lane-dense (rows, cols, tile_rows) factorization, or None.

    cols is the largest multiple of 128 (<= max_cols) dividing n_elems.
    tile_rows targets ~`target_tile_bytes` per tile, dtype-aware sublane
    aligned; exact divisors are preferred, otherwise a large aligned tile
    with a ragged last block (Pallas masks the tail writeback).
    """
    if n_elems % 128 != 0:
        return None
    itemsize = jnp.dtype(dtype).itemsize
    sublane = _sublane_multiple(dtype)

    cols = 128
    c = 256
    while c <= max_cols:
        if n_elems % c == 0:
            cols = c
        c += 128
    rows = n_elems // cols

    if rows * cols * itemsize <= target_tile_bytes:
        # Single block equal to the full array extent (allowed by the (8,128)
        # rule) and bounded by target_tile_bytes — no VMEM hazard on v7x.
        return rows, cols, rows

    target_rows = max(sublane, target_tile_bytes // (cols * itemsize))
    target_rows = (target_rows // sublane) * sublane

    # Prefer an exact (divisor) tiling so every block is full.
    tile_rows = 0
    d = sublane
    while d <= target_rows:
        if rows % d == 0:
            tile_rows = d
        d += sublane

    if tile_rows == 0 or tile_rows * 8 < target_rows:
        # Awkward factorization (e.g. rows = 8 * prime): don't collapse to
        # tiny tiles — use a large aligned tile and a ragged last block.
        tile_rows = min(target_rows, rows)
    return rows, cols, tile_rows


# --------------------------------------------------------------------------
# Forward wrapper (IdentityObsEncoder.forward)
# --------------------------------------------------------------------------
def identity_obs_encoder(observations, camera_data=None, dummy_input=None, *,
                         force_kernel=False,
                         kernel_mode="copy",
                         donate_input=False,
                         min_kernel_bytes=1 * _MIB,
                         target_tile_bytes=4 * _MIB):
    """Pallas equivalent of IdentityObsEncoder.forward (a pure identity).

    camera_data / dummy_input are accepted and ignored, matching the PyTorch
    module.  The default path returns `observations` directly — the exact,
    zero-cost identity.  A kernel boundary is only introduced when
    `force_kernel=True` and the array is at least `min_kernel_bytes` large.
    """
    observations = jnp.asarray(observations)
    nbytes = observations.size * observations.dtype.itemsize

    # Default / small-input path: no kernel launch at all.
    if (not force_kernel) or observations.ndim == 0 or observations.size == 0 \
            or nbytes < min_kernel_bytes:
        return observations

    if kernel_mode == "noop":
        # O(1) kernel boundary: refs stay in HBM, output aliased to input.
        # Zero-copy when the caller donates `observations` (jit
        # donate_argnums); otherwise XLA's defensive copy makes it a single
        # plain copy — still cheaper than an HBM->VMEM->HBM round trip.
        return pl.pallas_call(
            _noop_kernel,
            out_shape=jax.ShapeDtypeStruct(observations.shape,
                                           observations.dtype),
            in_specs=[pl.BlockSpec(memory_space=pl.ANY)],
            out_specs=pl.BlockSpec(memory_space=pl.ANY),
            input_output_aliases={0: 0},
            cost_estimate=pl.CostEstimate(flops=0, transcendentals=0,
                                          bytes_accessed=0),
        )(observations)

    # kernel_mode == "copy": lane-dense tiled copy.
    layout = _lane_dense_layout(observations.size, observations.dtype,
                                target_tile_bytes=target_tile_bytes)
    if layout is None:
        # Lane-dense tiling would need padding; the op is a pure identity, so
        # returning the input is exact and strictly cheaper than any copy.
        return observations

    rows, cols, tile_rows = layout
    x2d = observations.reshape(rows, cols)

    out2d = pl.pallas_call(
        _copy_kernel,
        out_shape=jax.ShapeDtypeStruct((rows, cols), observations.dtype),
        grid=(pl.cdiv(rows, tile_rows),),
        in_specs=[pl.BlockSpec((tile_rows, cols), lambda i: (i, 0))],
        out_specs=pl.BlockSpec((tile_rows, cols), lambda i: (i, 0)),
        # Only alias when the caller actually donates the input buffer;
        # aliasing a live buffer triggers a defensive copy in XLA.
        input_output_aliases=({0: 0} if donate_input else {}),
        cost_estimate=pl.CostEstimate(flops=0, transcendentals=0,
                                      bytes_accessed=2 * nbytes),
        compiler_params=pltpu.CompilerParams(
            dimension_semantics=("parallel",),
            vmem_limit_bytes=32 * _MIB),
    )(x2d)

    return out2d.reshape(observations.shape)


if __name__ == "__main__":
    key = jax.random.PRNGKey(0)
    k_obs, k_cam = jax.random.split(key)

    # Small shapes consistent with an observation encoder:
    # observations: (batch=2, seq=8, obs_dim=32); camera_data is unused.
    observations = jax.random.normal(k_obs, (2, 8, 32), dtype=jnp.float32)
    camera_data = jax.random.normal(k_cam, (2, 8, 3, 16, 16),
                                    dtype=jnp.float32)

    # 1) Default (recommended) path: pure identity, no kernel launch.
    encoded = identity_obs_encoder(observations, camera_data)
    encoded = jax.block_until_ready(encoded)
    assert encoded.shape == observations.shape
    assert encoded.dtype == observations.dtype
    assert bool(jnp.array_equal(encoded, observations))

    # 2) Explicit kernel boundary: lane-dense tiled copy.  min_kernel_bytes=0
    #    so the small demo array actually exercises the pallas_call once.
    encoded_k = identity_obs_encoder(observations, camera_data,
                                     force_kernel=True, kernel_mode="copy",
                                     min_kernel_bytes=0)
    encoded_k = jax.block_until_ready(encoded_k)
    assert encoded_k.shape == observations.shape
    assert encoded_k.dtype == observations.dtype
    assert bool(jnp.array_equal(encoded_k, observations))

    print("KERNEL_OK")
</pallas_src>

<mosaic_0001>
module attributes {stable_mosaic.version = 11 : i64} {
  func.func @_copy_kernel(%arg0: i32, %arg1: memref<1x512xf32, #tpu.memory_space<vmem>>, %arg2: memref<1x512xf32, #tpu.memory_space<vmem>>) attributes {dimension_semantics = [#tpu.dimension_semantics<parallel>], iteration_bounds = array<i64: 1>, scalar_prefetch = 0 : i64, scratch_operands = 0 : i64, tpu.core_type = #tpu.core_type<tc>, window_params = [{transform_indices = @transform_0, window_bounds = array<i64: 1, 512>}, {transform_indices = @transform_1, window_bounds = array<i64: 1, 512>}]} {
    %c0 = arith.constant 0 : index
    %c0_0 = arith.constant 0 : index
    %0 = vector.load %arg1[%c0, %c0_0] : memref<1x512xf32, #tpu.memory_space<vmem>>, vector<1x512xf32>
    %c0_1 = arith.constant 0 : index
    %c0_2 = arith.constant 0 : index
    %1 = vector.load %arg2[%c0_1, %c0_2] : memref<1x512xf32, #tpu.memory_space<vmem>>, vector<1x512xf32>
    tpu.vector_store %arg2[%c0_1, %c0_2], %0 {strides = array<i32>} : memref<1x512xf32, #tpu.memory_space<vmem>>, vector<1x512xf32>,
    return
  }
  func.func @transform_0(%arg0: i32) -> (i32, i32) {
    %c0_i32 = arith.constant 0 : i32
    %c0_i32_0 = arith.constant 0 : i32
    return %arg0, %c0_i32 : i32, i32
  }
  func.func @transform_1(%arg0: i32) -> (i32, i32) {
    %c0_i32 = arith.constant 0 : i32
    %c0_i32_0 = arith.constant 0 : i32
    return %arg0, %c0_i32 : i32, i32
  }
}

</mosaic_0001>

<bundles_post_ra>
// kernel: tpu_custom_call.1
= control target key start
LH: loop header
LB: loop body
LE: loop exit
PB: predicated region body
PF: predicated region fallthrough
CT: control target
= control target key end

     0   :  { %6 = vsyncpa [#allocation3], 0  ;;  %s128_s0 = inlined_call_operand.hbm [shape: f32[1,512], index: 0, kind: input, shape index: {}]   ;;  %s129_s1 = inlined_call_operand.hbm [shape: f32[1,512], index: 1, kind: output, shape index: {}]  }
   0x1   :  { %7 = vsyncpa [#allocation4], 0  ;;  %s92_s6 = smov [#allocation2]   ;;  %s44_s10 = scalar_lea.hbm %s128_s0, 64 }
   0x2   :  { %s14_s7 = sshll.u32 %s92_s6, 4  ;;  %p45_p0 = scmp.ne.s32.totalorder %s128_s0, %s44_s10  ;;  %s15_s7 = int_to_ptr.vmem [resolvable:$true] %s14_s7 }
   0x3   :  { %p48_p1 = scmp.lt.u32.totalorder %s44_s10, %s128_s0 }
   0x5   :  { %p50_p2 = pnand %p48_p1, %p45_p0 }
   0x7   :  { %53 = shalt.err (!%p50_p2)
}
   0x8   :  { %s54_s15 = scalar_lea.vmem %s15_s7, 64  ;;  %p59_p4 = scmp.lt.s32.totalorder %s15_s7, %s15_s7 }
   0x9   :  { %p55_p3 = scmp.ne.s32.totalorder %s15_s7, %s54_s15  ;;  %p60_p5 = scmp.lt.s32.totalorder %s54_s15, %s54_s15 }
   0xb   :  { %p61_p6 = por %p60_p5, %p59_p4 }
   0xd   :  { %p62_p7 = pnand %p61_p6, %p55_p3 }
   0xf   :  { %65 = shalt.err (!%p62_p7)
}
  0x10   :  { %17 = dma.hbm_to_vmem [thread:$0]  %s128_s0, 64, %s15_s7, [#allocation3]  }
  0x11   :  { %88 = dma.done.wait [#allocation3], 64  }
  0x12   :  { %89 = vsyncadd [#allocation3], 4294967232  ;;  %v22_v0 = vlaneseq  ;;  %s93_s18 = smov [#allocation5]   ;;  %v21_v1 = vld [vmem:[#allocation2] sm:$0xf] }
  0x13   :  { %s33_s19 = sshll.u32 %s93_s18, 4  ;;  %s34_s19 = int_to_ptr.vmem [resolvable:$true] %s33_s19 }
  0x14   :  { %vm24_vm0 = vcmp.lt.s32.totalorder %v22_v0, 512  ;;  %s66_s20 = scalar_lea.vmem %s34_s19, 64  ;;  %p71_p9 = scmp.lt.s32.totalorder %s34_s19, %s34_s19 }
  0x15   :  { %26 = vst.msk [vmem:[#allocation5] sm:$0xf] %vm24_vm0, %v21_v1  ;;  %p67_p8 = scmp.ne.s32.totalorder %s34_s19, %s66_s20  ;;  %p72_p10 = scmp.lt.s32.totalorder %s66_s20, %s66_s20 }
  0x17   :  { %p73_p11 = por %p72_p10, %p71_p9 }
  0x19   :  { %p74_p12 = pnand %p73_p11, %p67_p8 }
  0x1b   :  { %77 = shalt.err (!%p74_p12)
}
  0x1c   :  { %s78_s0 = scalar_lea.hbm %s129_s1, 64 }
  0x1d   :  { %p79_p13 = scmp.ne.s32.totalorder %s129_s1, %s78_s0  ;;  %p82_p0 = scmp.lt.u32.totalorder %s78_s0, %s129_s1 }
  0x1f   :  { %p84_p1 = pnand %p82_p0, %p79_p13 }
  0x21   :  { %87 = shalt.err (!%p84_p1)
}
  0x22   :  { %36 = dma.vmem_to_hbm [thread:$0]  %s34_s19, 64, %s129_s1, [#allocation4]  }
  0x23   :  { %90 = dma.done.wait [#allocation4], 64  }
  0x24   :  { %91 = vsyncadd [#allocation4], 4294967232 }
  0x25   :  { %40 = vsyncpa [#allocation3], 1 }
  0x26   :  { %41 = vsyncpa [#allocation4], 1 }

</bundles_post_ra>
